<compile_context>
chip_gen: v7x
topology: tpu7x:2x2x1
jax: 0.10.0
libtpu: 0.0.40
codegen_flags: <defaults>
</compile_context>

<pallas_src>
import functools

import jax
import jax.numpy as jnp
from jax.experimental import pallas as pl
from jax.experimental.pallas import tpu as pltpu


def _attn_conv1x1_kernel(x_ref, *refs, num_layers, temperature, total_px):
    """Fused conv1x1 stack + attention normalization for one batch element.

    x_ref   : (1, C, S) feature block (spatial on lanes)
    refs    : [w1 (C,C), b1 (C,1)] * num_layers, w_final (C,1), b_final (1,1), o_ref (1,1,S)
    """
    o_ref = refs[-1]
    w_refs = refs[:-1]

    h = x_ref[0].astype(jnp.float32)  # (C, S)

    # Hidden 1x1 convs + ReLU: h <- relu(W @ h + b), all in f32.
    for li in range(num_layers):
        w = w_refs[2 * li][...].astype(jnp.float32)       # (C, C)
        b = w_refs[2 * li + 1][...].astype(jnp.float32)   # (C, 1) -> lane broadcast
        h = jnp.dot(w, h, preferred_element_type=jnp.float32) + b
        h = jnp.maximum(h, 0.0)

    # Final nc -> 1 conv as broadcast-multiply + sublane reduce (VPU/XLU only).
    wf = w_refs[-2][...].astype(jnp.float32)   # (C, 1)
    bf = w_refs[-1][...].astype(jnp.float32)   # (1, 1)
    y = jnp.sum(wf * h, axis=0, keepdims=True) + bf       # (1, S)

    # Attention post-processing, fully fused (output stays in VMEM).
    y = y / temperature
    g = jnp.log(jnp.maximum(y, 0.0) + 1.01)                # (1, S)
    s = jnp.sum(g, keepdims=True)                          # (1, 1) spatial sum
    out = g / s * total_px
    out = jnp.clip(out, 0.01, 100.0)

    o_ref[0] = out.astype(o_ref.dtype)


def attn_conv1x1(x_nchw, params, output_shape, temperature=8.0):
    """Apply AttnConv1x1 to an NCHW input using a single fused Pallas kernel.

    params: list of (w, b) in PyTorch conv layout: num_layers entries with
            w (nc, nc), b (nc,), followed by the final (1, nc), (1,) layer.
    """
    n, c, h, w = x_nchw.shape
    nh, nw = output_shape
    s = nh * nw
    num_layers = len(params) - 1

    # Nearest-neighbor interpolation (matches F.interpolate mode='nearest'):
    # src_idx = floor(dst_idx * in / out). Static gather, stays in NCHW.
    idx_h = (jnp.arange(nh) * h) // nh
    idx_w = (jnp.arange(nw) * w) // nw
    x_r = x_nchw[:, :, idx_h, :][:, :, :, idx_w]      # (N, C, nh, nw)
    x_r = x_r.reshape(n, c, s)                        # free reshape: spatial -> lanes

    # Flatten weights/biases into kernel-ready 2-D shapes.
    flat_args = []
    in_specs = [pl.BlockSpec((1, c, s), lambda b: (b, 0, 0))]   # feature block
    for li in range(num_layers):
        wl, bl = params[li]
        flat_args += [wl, bl.reshape(c, 1)]
        in_specs += [pl.BlockSpec((c, c), lambda b: (0, 0)),
                     pl.BlockSpec((c, 1), lambda b: (0, 0))]
    wfin, bfin = params[-1]
    flat_args += [wfin.reshape(1, c).T, bfin.reshape(1, 1)]     # (C,1), (1,1)
    in_specs += [pl.BlockSpec((c, 1), lambda b: (0, 0)),
                 pl.BlockSpec((1, 1), lambda b: (0, 0))]

    kernel = functools.partial(
        _attn_conv1x1_kernel,
        num_layers=num_layers,
        temperature=float(temperature),
        total_px=float(s),
    )

    # VMEM budget: double-buffered feature block + output block + resident
    # weights, with headroom.  Capped below v7x's 64 MiB physical VMEM.
    block_bytes = c * s * x_nchw.dtype.itemsize + s * 4
    vmem_limit = int(min(max(6 * block_bytes + (1 << 20), 16 * 2**20), 48 * 2**20))

    out = pl.pallas_call(
        kernel,
        out_shape=jax.ShapeDtypeStruct((n, 1, s), x_nchw.dtype),
        grid_spec=pltpu.PrefetchScalarGridSpec(
            num_scalar_prefetch=0,
            grid=(n,),
            in_specs=in_specs,
            out_specs=pl.BlockSpec((1, 1, s), lambda b: (b, 0, 0)),
        ),
        compiler_params=pltpu.CompilerParams(
            dimension_semantics=("parallel",),
            vmem_limit_bytes=vmem_limit,
        ),
    )(x_r, *flat_args)

    return out.reshape(n, 1, nh, nw)


def init_params(key, nc, num_layers=2):
    """PyTorch-style init: Conv2d(nc,nc,1) x num_layers, then Conv2d(nc,1,1).

    Weights stored as (C_out, C_in) = weight[:, :, 0, 0]; uniform bounds
    +-1/sqrt(fan_in) with fan_in = nc * 1 * 1.
    """
    params = []
    bound = 1.0 / float(nc) ** 0.5
    for _ in range(num_layers):
        key, kw, kb = jax.random.split(key, 3)
        wgt = jax.random.uniform(kw, (nc, nc), jnp.float32, -bound, bound)
        b = jax.random.uniform(kb, (nc,), jnp.float32, -bound, bound)
        params.append((wgt, b))
    key, kw, kb = jax.random.split(key, 3)
    wgt = jax.random.uniform(kw, (1, nc), jnp.float32, -bound, bound)
    b = jax.random.uniform(kb, (1,), jnp.float32, -bound, bound)
    params.append((wgt, b))
    return params


def _reference(x_nchw, params, output_shape, temperature=8.0):
    """Plain-JAX reference of the same forward pass (sanity check)."""
    n, c, h, w = x_nchw.shape
    nh, nw = output_shape
    idx_h = (jnp.arange(nh) * h) // nh
    idx_w = (jnp.arange(nw) * w) // nw
    feat = x_nchw[:, :, idx_h, :][:, :, :, idx_w]
    num_layers = len(params) - 1
    for li in range(num_layers):
        wl, bl = params[li]
        feat = jnp.einsum('oi,nihw->nohw', wl, feat) + bl[None, :, None, None]
        feat = jnp.maximum(feat, 0.0)
    wf, bf = params[-1]
    feat = jnp.einsum('oi,nihw->nohw', wf, feat) + bf[None, :, None, None]
    feat = feat / temperature
    feat = jnp.log(jnp.maximum(feat, 0.0) + 1.01)
    ssum = feat.sum(axis=(2, 3), keepdims=True)
    feat = feat / ssum * (nh * nw)
    return jnp.clip(feat, 0.01, 100.0)


if __name__ == "__main__":
    nc = 4
    num_layers = 2
    output_shape = (32, 32)     # nh*nw = 1024 lanes: lane-dense blocks
    temperature = 8.0

    key = jax.random.PRNGKey(0)
    k_x, k_p = jax.random.split(key)

    x = jax.random.normal(k_x, (2, nc, 16, 16), jnp.float32)   # NCHW, like PyTorch
    params = init_params(k_p, nc, num_layers=num_layers)

    fn = jax.jit(functools.partial(attn_conv1x1, params=params,
                                   output_shape=output_shape,
                                   temperature=temperature))
    out = fn(x)
    jax.block_until_ready(out)

    ref = _reference(x, params, output_shape, temperature)
    assert out.shape == (2, 1, output_shape[0], output_shape[1])
    assert jnp.allclose(out, ref, atol=1e-5, rtol=1e-5), float(
        jnp.max(jnp.abs(out - ref)))

    print("KERNEL_OK")
</pallas_src>

<mosaic_0001>
module attributes {stable_mosaic.version = 11 : i64} {
  func.func @_attn_conv1x1_kernel(%arg0: i32, %arg1: memref<1x4x1024xf32, #tpu.memory_space<vmem>>, %arg2: memref<4x4xf32, #tpu.memory_space<vmem>>, %arg3: memref<4x1xf32, #tpu.memory_space<vmem>>, %arg4: memref<4x4xf32, #tpu.memory_space<vmem>>, %arg5: memref<4x1xf32, #tpu.memory_space<vmem>>, %arg6: memref<4x1xf32, #tpu.memory_space<vmem>>, %arg7: memref<1x1xf32, #tpu.memory_space<vmem>>, %arg8: memref<1x1x1024xf32, #tpu.memory_space<vmem>>) attributes {dimension_semantics = [#tpu.dimension_semantics<parallel>], iteration_bounds = array<i64: 2>, scalar_prefetch = 0 : i64, scratch_operands = 0 : i64, tpu.core_type = #tpu.core_type<tc>, window_params = [{transform_indices = @transform_0, window_bounds = array<i64: 1, 4, 1024>}, {pipeline_mode = #tpu.pipeline_mode<synchronous>, transform_indices = @transform_1, window_bounds = array<i64: 4, 4>}, {pipeline_mode = #tpu.pipeline_mode<synchronous>, transform_indices = @transform_2, window_bounds = array<i64: 4, 1>}, {pipeline_mode = #tpu.pipeline_mode<synchronous>, transform_indices = @transform_3, window_bounds = array<i64: 4, 4>}, {pipeline_mode = #tpu.pipeline_mode<synchronous>, transform_indices = @transform_4, window_bounds = array<i64: 4, 1>}, {pipeline_mode = #tpu.pipeline_mode<synchronous>, transform_indices = @transform_5, window_bounds = array<i64: 4, 1>}, {pipeline_mode = #tpu.pipeline_mode<synchronous>, transform_indices = @transform_6, window_bounds = array<i64: 1, 1>}, {transform_indices = @transform_7, window_bounds = array<i64: 1, 1, 1024>}]} {
    %c0 = arith.constant 0 : index
    %c0_0 = arith.constant 0 : index
    %c0_1 = arith.constant 0 : index
    %0 = vector.load %arg1[%c0, %c0_0, %c0_1] : memref<1x4x1024xf32, #tpu.memory_space<vmem>>, vector<1x4x1024xf32>
    %1 = vector.shape_cast %0 : vector<1x4x1024xf32> to vector<4x1024xf32>
    %c0_2 = arith.constant 0 : index
    %c0_3 = arith.constant 0 : index
    %2 = vector.load %arg2[%c0_2, %c0_3] : memref<4x4xf32, #tpu.memory_space<vmem>>, vector<4x4xf32>
    %c0_4 = arith.constant 0 : index
    %c0_5 = arith.constant 0 : index
    %3 = vector.load %arg3[%c0_4, %c0_5] : memref<4x1xf32, #tpu.memory_space<vmem>>, vector<4x1xf32>
    %cst = arith.constant dense<0.000000e+00> : vector<4x1024xf32>
    %4 = tpu.matmul %2, %1, %cst {dimension_numbers = #tpu.dot_dimension_numbers<[1], [0], [0], [1], [0, 0, 1, 1], [], []>} : vector<4x4xf32>, vector<4x1024xf32>, vector<4x1024xf32> -> vector<4x1024xf32>
    %5 = vector.broadcast %3 : vector<4x1xf32> to vector<4x1024xf32>
    %6 = arith.addf %4, %5 : vector<4x1024xf32>
    %cst_6 = arith.constant 0.000000e+00 : f32
    %7 = vector.broadcast %cst_6 : f32 to vector<4x1024xf32>
    %8 = arith.maximumf %6, %7 : vector<4x1024xf32>
    %c0_7 = arith.constant 0 : index
    %c0_8 = arith.constant 0 : index
    %9 = vector.load %arg4[%c0_7, %c0_8] : memref<4x4xf32, #tpu.memory_space<vmem>>, vector<4x4xf32>
    %c0_9 = arith.constant 0 : index
    %c0_10 = arith.constant 0 : index
    %10 = vector.load %arg5[%c0_9, %c0_10] : memref<4x1xf32, #tpu.memory_space<vmem>>, vector<4x1xf32>
    %cst_11 = arith.constant dense<0.000000e+00> : vector<4x1024xf32>
    %11 = tpu.matmul %9, %8, %cst_11 {dimension_numbers = #tpu.dot_dimension_numbers<[1], [0], [0], [1], [0, 0, 1, 1], [], []>} : vector<4x4xf32>, vector<4x1024xf32>, vector<4x1024xf32> -> vector<4x1024xf32>
    %12 = vector.broadcast %10 : vector<4x1xf32> to vector<4x1024xf32>
    %13 = arith.addf %11, %12 : vector<4x1024xf32>
    %cst_12 = arith.constant 0.000000e+00 : f32
    %14 = vector.broadcast %cst_12 : f32 to vector<4x1024xf32>
    %15 = arith.maximumf %13, %14 : vector<4x1024xf32>
    %c0_13 = arith.constant 0 : index
    %c0_14 = arith.constant 0 : index
    %16 = vector.load %arg6[%c0_13, %c0_14] : memref<4x1xf32, #tpu.memory_space<vmem>>, vector<4x1xf32>
    %c0_15 = arith.constant 0 : index
    %c0_16 = arith.constant 0 : index
    %17 = vector.load %arg7[%c0_15, %c0_16] : memref<1x1xf32, #tpu.memory_space<vmem>>, vector<1x1xf32>
    %18 = vector.broadcast %16 : vector<4x1xf32> to vector<4x1024xf32>
    %19 = arith.mulf %18, %15 : vector<4x1024xf32>
    %cst_17 = arith.constant dense<0.000000e+00> : vector<1024xf32>
    %20 = vector.multi_reduction <add>, %19, %cst_17 [0] : vector<4x1024xf32> to vector<1024xf32>
    %21 = vector.shape_cast %20 : vector<1024xf32> to vector<1x1024xf32>
    %22 = vector.broadcast %17 : vector<1x1xf32> to vector<1x1024xf32>
    %23 = arith.addf %21, %22 : vector<1x1024xf32>
    %cst_18 = arith.constant 8.000000e+00 : f32
    %24 = vector.broadcast %cst_18 : f32 to vector<1x1024xf32>
    %25 = arith.divf %23, %24 : vector<1x1024xf32>
    %cst_19 = arith.constant 0.000000e+00 : f32
    %26 = vector.broadcast %cst_19 : f32 to vector<1x1024xf32>
    %27 = arith.maximumf %25, %26 : vector<1x1024xf32>
    %cst_20 = arith.constant 1.010000e+00 : f32
    %28 = vector.broadcast %cst_20 : f32 to vector<1x1024xf32>
    %29 = arith.addf %27, %28 : vector<1x1024xf32>
    %30 = math.log %29 : vector<1x1024xf32>
    %31 = vector.shape_cast %30 : vector<1x1024xf32> to vector<1x1x1024xf32>
    %cst_21 = arith.constant dense<0.000000e+00> : vector<1xf32>
    %32 = vector.multi_reduction <add>, %31, %cst_21 [1, 2] : vector<1x1x1024xf32> to vector<1xf32>
    %33 = vector.shape_cast %32 : vector<1xf32> to vector<1x1x1xf32>
    %34 = vector.extract %33[0, 0, 0] : f32 from vector<1x1x1xf32>
    %35 = vector.broadcast %34 : f32 to vector<1x1xf32>
    %36 = vector.broadcast %35 : vector<1x1xf32> to vector<1x1024xf32>
    %37 = arith.divf %30, %36 : vector<1x1024xf32>
    %cst_22 = arith.constant 1.024000e+03 : f32
    %38 = vector.broadcast %cst_22 : f32 to vector<1x1024xf32>
    %39 = arith.mulf %37, %38 : vector<1x1024xf32>
    %cst_23 = arith.constant 0.00999999977 : f32
    %cst_24 = arith.constant 1.000000e+02 : f32
    %40 = vector.broadcast %cst_23 : f32 to vector<1x1024xf32>
    %41 = arith.maximumf %40, %39 : vector<1x1024xf32>
    %42 = vector.broadcast %cst_24 : f32 to vector<1x1024xf32>
    %43 = arith.minimumf %42, %41 : vector<1x1024xf32>
    %c0_25 = arith.constant 0 : index
    %c0_26 = arith.constant 0 : index
    %c0_27 = arith.constant 0 : index
    %44 = vector.load %arg8[%c0_25, %c0_26, %c0_27] : memref<1x1x1024xf32, #tpu.memory_space<vmem>>, vector<1x1x1024xf32>
    %45 = vector.shape_cast %44 : vector<1x1x1024xf32> to vector<1x1024xf32>
    %46 = vector.shape_cast %43 : vector<1x1024xf32> to vector<1x1x1024xf32>
    tpu.vector_store %arg8[%c0_25, %c0_26, %c0_27], %46 {strides = array<i32>} : memref<1x1x1024xf32, #tpu.memory_space<vmem>>, vector<1x1x1024xf32>,
    return
  }
  func.func @transform_0(%arg0: i32) -> (i32, i32, i32) {
    %c0_i32 = arith.constant 0 : i32
    %c0_i32_0 = arith.constant 0 : i32
    %c0_i32_1 = arith.constant 0 : i32
    return %arg0, %c0_i32, %c0_i32_0 : i32, i32, i32
  }
  func.func @transform_1(%arg0: i32) -> (i32, i32) {
    %c0_i32 = arith.constant 0 : i32
    %c0_i32_0 = arith.constant 0 : i32
    %c0_i32_1 = arith.constant 0 : i32
    return %c0_i32, %c0_i32_0 : i32, i32
  }
  func.func @transform_2(%arg0: i32) -> (i32, i32) {
    %c0_i32 = arith.constant 0 : i32
    %c0_i32_0 = arith.constant 0 : i32
    %c0_i32_1 = arith.constant 0 : i32
    return %c0_i32, %c0_i32_0 : i32, i32
  }
  func.func @transform_3(%arg0: i32) -> (i32, i32) {
    %c0_i32 = arith.constant 0 : i32
    %c0_i32_0 = arith.constant 0 : i32
    %c0_i32_1 = arith.constant 0 : i32
    return %c0_i32, %c0_i32_0 : i32, i32
  }
  func.func @transform_4(%arg0: i32) -> (i32, i32) {
    %c0_i32 = arith.constant 0 : i32
    %c0_i32_0 = arith.constant 0 : i32
    %c0_i32_1 = arith.constant 0 : i32
    return %c0_i32, %c0_i32_0 : i32, i32
  }
  func.func @transform_5(%arg0: i32) -> (i32, i32) {
    %c0_i32 = arith.constant 0 : i32
    %c0_i32_0 = arith.constant 0 : i32
    %c0_i32_1 = arith.constant 0 : i32
    return %c0_i32, %c0_i32_0 : i32, i32
  }
  func.func @transform_6(%arg0: i32) -> (i32, i32) {
    %c0_i32 = arith.constant 0 : i32
    %c0_i32_0 = arith.constant 0 : i32
    %c0_i32_1 = arith.constant 0 : i32
    return %c0_i32, %c0_i32_0 : i32, i32
  }
  func.func @transform_7(%arg0: i32) -> (i32, i32, i32) {
    %c0_i32 = arith.constant 0 : i32
    %c0_i32_0 = arith.constant 0 : i32
    %c0_i32_1 = arith.constant 0 : i32
    return %arg0, %c0_i32, %c0_i32_0 : i32, i32, i32
  }
}

</mosaic_0001>

<bundles_post_ra>
// kernel: attn_conv1x1.1
= control target key start
LH: loop header
LB: loop body
LE: loop exit
PB: predicated region body
PF: predicated region fallthrough
CT: control target
= control target key end

     0   :  { %s1363_s26 = smov 0   ;;  %s1461_s0 = inlined_call_operand.vmem [shape: f32[2,4,1024], index: 0, kind: input, shape index: {}]   ;;  %s1462_s1 = inlined_call_operand.vmem [shape: f32[4,4], index: 1, kind: input, shape index: {}]   ;;  %s1463_s2 = inlined_call_operand.vmem [shape: f32[4,1], index: 2, kind: input, shape index: {}]   ;;  %s1464_s3 = inlined_call_operand.vmem [shape: f32[4,4], index: 3, kind: input, shape index: {}]   ;;  %s1465_s4 = inlined_call_operand.vmem [shape: f32[4,1], index: 4, kind: input, shape index: {}]   ;;  %s1466_s5 = inlined_call_operand.vmem [shape: f32[4,1], index: 5, kind: input, shape index: {}]   ;;  %s1467_s6 = inlined_call_operand.<no memory space> [shape: f32[1,1], index: 6, kind: input, shape index: {}]   ;;  %s1468_s7 = inlined_call_operand.vmem [shape: f32[2,1,1024], index: 7, kind: output, shape index: {}]  }
   0x1   :  { %v12_v0 = vstv %s1467_s6 }
   0x2   :  { %13 = vst [vmem:[#allocation2] sm:$0x1] %v12_v0 }
   0x3 LB: > { %s1237_s27 = sadd.s32 4294967295, %s1315_s26   ;;  %p1241_p0 = scmp.ge.s32.totalorder %s1315_s26, 1  ;;  %s1315_s26 = sphi %s1363_s26, %s19_s26  }
   0x4   : > { %p239_p1 = scmp.lt.s32.totalorder %s1315_s26, 3 }
   0x6   : > { %p240_p2 = pnand %p1241_p0, %p239_p1 }
   0x7   : > { %p270_p3 = scmp.lt.s32.totalorder (!%p240_p2), %s1237_s27, 1  ;;  %v1317_v1 = vmov (!%p240_p2), 0.0   ;;  %v284_v2 = vld [vmem:[%s1463_s2] sm:$0xf] (!%p240_p2)  ;;  %v1318_v3 = vmov (!%p240_p2), 0   ;;  %vm302_vm0 = vcmask (!%p240_p2), 1043456   ;;  %v1013_v42 = vlaneseq (!%p240_p2) }
   0x8   : > { %243 = sbr.rel (%p240_p2) target bundleno = 748 (0x2ec), region = 48  ;;  %383 = vmatprep.mubr.f32.mxu0 (!%p240_p2), %v1317_v1  ;;  %454 = vmatprep.mubr.f32.mxu1 (!%p240_p2), %v1317_v1  ;;  %v612_v4 = vld [vmem:[%s1465_s4] sm:$0xf] (!%p240_p2)  ;;  %vm298_vm1 = vcmask (!%p240_p2), 31744   ;;  %vm1066_vm2 = vcmask (!%p240_p2), 1040384  }
   0x9   : > { %1285 = vset.pattern.permute.xlu0 (!%p240_p2), %v1318_v3  ;;  %1286 = vset.pattern.permute.xlu1 (!%p240_p2), %v1318_v3  ;;  %v283_v11 = vld [vmem:[%s1462_s1] sm:$0xf] (!%p240_p2)  ;;  %v1424_v44 = vshrl.u32 (!%p240_p2), %v1013_v42, 7 }
   0xa   : > { %287 = vperm.xlu0 (!%p240_p2), %1285, %v284_v2   ;;  %v937_v14 = vld [vmem:[%s1466_s5] sm:$0xf] (!%p240_p2) }
   0xb   : > { %941 = vperm.xlu1 (!%p240_p2), %1286, %v937_v14   ;;  %v938_v15 = vld [vmem:[#allocation2] sm:$0x1] (!%p240_p2)  ;;  %v1015_v49 = vsub.s32 (!%p240_p2), 0, %v1424_v44 }
   0xc   : > { %v611_v35 = vld [vmem:[%s1464_s3] sm:$0xf] (!%p240_p2) }
   0xe   : > { %615 = vperm.xlu0 (!%p240_p2), %1285, %v612_v4  }
   0xf   : > { %s1470_s27 = smov (!%p270_p3, %s1237_s27), 1  ;;  %1010 = vperm.xlu1 %1286, %v938_v15  }
  0x10   : > { %s1271_s29 = sshll.u32 %s1470_s27, 5  ;;  %s1244_s19 = sshll.u32 %s1470_s27, 3 }
  0x11   : > { %s274_s11 = scalar_lea.vmem %s1461_s0, %s1271_s29  ;;  %s278_s22 = scalar_lea.vmem %s1468_s7, %s1244_s19 }
  0x12   : > { %v279_v5 = vld [vmem:[%s274_s11] sm:$0xff]  ;;  %v280_v6 = vld [vmem:[%s274_s11 + $0x8] sm:$0xff]  ;;  %v281_v7 = vld [vmem:[%s274_s11 + $0x10] sm:$0xff] }
  0x13   : > { %v294_v8 = vcombine.high %v279_v5, %v279_v5  ;;  %v295_v9 = vcombine.high %v280_v6, %v280_v6  ;;  %v282_v10 = vld [vmem:[%s274_s11 + $0x18] sm:$0xff]  ;;  %v296_v12 = vcombine.high %v281_v7, %v281_v7 }
  0x14   : > { %v297_v13 = vcombine.high %v282_v10, %v282_v10 }
  0x15   : > { %1245 = vmatprep.subr.msk.mxu0 %vm302_vm0, %v294_v8  ;;  %1248 = vmatprep.subr.msk.mxu1 %vm302_vm0, %v295_v9 }
  0x16   : > { %1246 = vmatpush1.msk.msra.mxu0 %vm302_vm0, %v279_v5  ;;  %1249 = vmatpush1.msk.msra.mxu1 %vm302_vm0, %v280_v6 }
  0x17   : > { %1247 = vmatmul.mubr.msk.f32.vlgmr.msra.gmra.mrb[0].mxu0 %vm298_vm1, %v283_v11  ;;  %1250 = vmatmul.mubr.msk.f32.vlgmr.msra.gmra.mrb[0].mxu1 %vm298_vm1, %v283_v11 }
  0x18   : > { %1251 = vmatprep.subr.msk.mxu0 %vm302_vm0, %v296_v12  ;;  %1254 = vmatprep.subr.msk.mxu1 %vm302_vm0, %v297_v13 }
  0x19   : > { %1252 = vmatpush1.msk.msra.mxu0 %vm302_vm0, %v281_v7  ;;  %525 = vmatprep.mubr.f32.mxu0 %v1317_v1 }
  0x1a   : > { %1255 = vmatpush1.msk.msra.mxu1 %vm302_vm0, %v282_v10  ;;  %596 = vmatprep.mubr.f32.mxu1 %v1317_v1 }
  0x1b   : > { %1253 = vmatmul.mubr.msk.f32.vlgmr.msra.gmra.mrb[2].mxu0 %vm298_vm1, %v283_v11  ;;  %1256 = vmatmul.mubr.msk.f32.vlgmr.msra.gmra.mrb[2].mxu1 %vm298_vm1, %v283_v11 }
  0x1c   : > { %709 = vmatprep.mubr.f32.mxu0 %v1317_v1  ;;  %780 = vmatprep.mubr.f32.mxu1 %v1317_v1 }
  0x89   : > { %v288_v16 = vpop.permute.xlu0 %287 }
  0x8a   : > { %v942_v43 = vpop.permute.xlu1 %941 }
  0x8d   : > { %v616_v45 = vpop.permute.xlu0 %615 }
  0x8e   : > { %v1011_v46 = vpop.permute.xlu1 %1010 }
  0x8f   : > { %v1427_v62 = vrot.slane %v1011_v46, %v1015_v49 }
  0xea   : > { %v385_v17 = vpop.f32.mrb[0].mxu0  ;;  %v456_v18 = vpop.f32.mrb[0].mxu1 }
  0xeb   : > { %v386_v19 = vadd.f32 %v385_v17, %v288_v16  ;;  %v457_v20 = vadd.f32 %v456_v18, %v288_v16  ;;  %v387_v21 = vpop.f32.mrb[1].mxu0  ;;  %v458_v22 = vpop.f32.mrb[1].mxu1 }
  0xec   : > { %v388_v23 = vadd.f32 %v387_v21, %v288_v16  ;;  %v459_v24 = vadd.f32 %v458_v22, %v288_v16 }
  0xed   : > { %v605_v25 = vmax.f32 %v457_v20, 0.0  ;;  %v603_v30 = vmax.f32 %v386_v19, 0.0 }
  0xee   : > { %v604_v26 = vmax.f32 %v388_v23, 0.0  ;;  %v606_v27 = vmax.f32 %v459_v24, 0.0  ;;  %v527_v28 = vpop.f32.mrb[2].mxu0  ;;  %v598_v29 = vpop.f32.mrb[2].mxu1 }
  0xef   : > { %v528_v31 = vadd.f32 %v527_v28, %v288_v16  ;;  %v599_v32 = vadd.f32 %v598_v29, %v288_v16  ;;  %v529_v33 = vpop.f32.mrb[3].mxu0  ;;  %v600_v34 = vpop.f32.mrb[3].mxu1 }
  0xf0   : > { %v530_v36 = vadd.f32 %v529_v33, %v288_v16  ;;  %v601_v37 = vadd.f32 %v600_v34, %v288_v16  ;;  %1257 = vmatprep.subr.msk.mxu0 %vm302_vm0, %v604_v26  ;;  %1260 = vmatprep.subr.msk.mxu1 %vm302_vm0, %v606_v27 }
  0xf1   : > { %1258 = vmatpush1.msk.msra.mxu0 %vm302_vm0, %v603_v30  ;;  %1261 = vmatpush1.msk.msra.mxu1 %vm302_vm0, %v605_v25  ;;  %v607_v40 = vmax.f32 %v528_v31, 0.0  ;;  %v609_v41 = vmax.f32 %v599_v32, 0.0 }
  0xf2   : > { %v608_v38 = vmax.f32 %v530_v36, 0.0  ;;  %v610_v39 = vmax.f32 %v601_v37, 0.0  ;;  %1259 = vmatmul.mubr.msk.f32.vlgmr.msra.gmra.mrb[4].mxu0 %vm298_vm1, %v611_v35  ;;  %1262 = vmatmul.mubr.msk.f32.vlgmr.msra.gmra.mrb[4].mxu1 %vm298_vm1, %v611_v35 }
  0xf3   : > { %851 = vmatprep.mubr.f32.mxu0 %v1317_v1  ;;  %922 = vmatprep.mubr.f32.mxu1 %v1317_v1 }
  0xf4   : > { %1263 = vmatprep.subr.msk.mxu0 %vm302_vm0, %v608_v38  ;;  %1266 = vmatprep.subr.msk.mxu1 %vm302_vm0, %v610_v39 }
  0xf5   : > { %1264 = vmatpush1.msk.msra.mxu0 %vm302_vm0, %v607_v40  ;;  %1267 = vmatpush1.msk.msra.mxu1 %vm302_vm0, %v609_v41 }
  0xf6   : > { %1265 = vmatmul.mubr.msk.f32.vlgmr.msra.gmra.mrb[6].mxu0 %vm298_vm1, %v611_v35  ;;  %1268 = vmatmul.mubr.msk.f32.vlgmr.msra.gmra.mrb[6].mxu1 %vm298_vm1, %v611_v35 }
 0x1c5   : > { %v711_v47 = vpop.f32.mrb[4].mxu0  ;;  %v782_v48 = vpop.f32.mrb[4].mxu1 }
 0x1c6   : > { %v712_v50 = vadd.f32 %v711_v47, %v616_v45  ;;  %v783_v51 = vadd.f32 %v782_v48, %v616_v45  ;;  %v713_v52 = vpop.f32.mrb[5].mxu0  ;;  %v784_v53 = vpop.f32.mrb[5].mxu1 }
 0x1c7   : > { %v714_v54 = vadd.f32 %v713_v52, %v616_v45  ;;  %v785_v55 = vadd.f32 %v784_v53, %v616_v45 }
 0x1c8   : > { %v929_v56 = vmax.f32 %v712_v50, 0.0  ;;  %v931_v57 = vmax.f32 %v783_v51, 0.0 }
 0x1c9   : > { %v930_v58 = vmax.f32 %v714_v54, 0.0  ;;  %v932_v59 = vmax.f32 %v785_v55, 0.0  ;;  %v853_v60 = vpop.f32.mrb[6].mxu0  ;;  %v924_v61 = vpop.f32.mrb[6].mxu1 }
 0x1ca   : > { %v944_v63 = vmul.f32 %v942_v43, %v929_v56  ;;  %v946_v0 = vmul.f32 %v942_v43, %v931_v57  ;;  %v854_v1 = vadd.f32 %v853_v60, %v616_v45  ;;  %v925_v2 = vadd.f32 %v924_v61, %v616_v45  ;;  %v855_v3 = vpop.f32.mrb[7].mxu0  ;;  %v926_v4 = vpop.f32.mrb[7].mxu1 }
 0x1cb   : > { %v945_v5 = vmul.f32 %v942_v43, %v930_v58  ;;  %v947_v6 = vmul.f32 %v942_v43, %v932_v59  ;;  %v856_v7 = vadd.f32 %v855_v3, %v616_v45  ;;  %v927_v8 = vadd.f32 %v926_v4, %v616_v45 }
 0x1cc   : > { %v952_v9 = vsel %vm302_vm0, %v944_v63, 0.0  ;;  %v966_v10 = vsel %vm302_vm0, %v946_v0, 0.0  ;;  %v933_v11 = vmax.f32 %v854_v1, 0.0  ;;  %v935_v12 = vmax.f32 %v925_v2, 0.0 }
 0x1cd   : > { %v953_v13 = vrot.slane %v952_v9, 4  ;;  %v959_v14 = vsel %vm302_vm0, %v945_v5, 0.0  ;;  %v967_v15 = vrot.slane %v966_v10, 4  ;;  %v973_v16 = vsel %vm302_vm0, %v947_v6, 0.0 }
 0x1ce   : > { %v960_v17 = vrot.slane %v959_v14, 4  ;;  %v974_v18 = vrot.slane %v973_v16, 4  ;;  %v948_v19 = vmul.f32 %v942_v43, %v933_v11  ;;  %v950_v20 = vmul.f32 %v942_v43, %v935_v12 }
 0x1cf   : > { %v954_v21 = vadd.f32 %v953_v13, %v952_v9  ;;  %v968_v22 = vadd.f32 %v967_v15, %v966_v10  ;;  %v934_v23 = vmax.f32 %v856_v7, 0.0  ;;  %v936_v24 = vmax.f32 %v927_v8, 0.0 }
 0x1d0   : > { %v961_v25 = vadd.f32 %v960_v17, %v959_v14  ;;  %v975_v26 = vadd.f32 %v974_v18, %v973_v16  ;;  %v980_v27 = vsel %vm302_vm0, %v948_v19, 0.0  ;;  %v994_v28 = vsel %vm302_vm0, %v950_v20, 0.0 }
 0x1d1   : > { %v955_v29 = vrot.slane %v954_v21, 2  ;;  %v969_v30 = vrot.slane %v968_v22, 2  ;;  %v981_v31 = vrot.slane %v980_v27, 4  ;;  %v995_v32 = vrot.slane %v994_v28, 4 }
 0x1d2   : > { %v962_v33 = vrot.slane %v961_v25, 2  ;;  %v949_v34 = vmul.f32 %v942_v43, %v934_v23  ;;  %v951_v35 = vmul.f32 %v942_v43, %v936_v24  ;;  %v976_v36 = vrot.slane %v975_v26, 2 }
 0x1d3   : > { %v956_v37 = vadd.f32 %v955_v29, %v954_v21  ;;  %v982_v38 = vadd.f32 %v981_v31, %v980_v27  ;;  %v996_v39 = vadd.f32 %v995_v32, %v994_v28  ;;  %v970_v40 = vadd.f32 %v969_v30, %v968_v22 }
 0x1d4   : > { %v963_v41 = vadd.f32 %v962_v33, %v961_v25  ;;  %v987_v42 = vsel %vm302_vm0, %v949_v34, 0.0  ;;  %v1001_v45 = vsel %vm302_vm0, %v951_v35, 0.0  ;;  %v977_v46 = vadd.f32 %v976_v36, %v975_v26 }
 0x1d5   : > { %v983_v47 = vrot.slane %v982_v38, 2  ;;  %v997_v48 = vrot.slane %v996_v39, 2  ;;  %v988_v49 = vrot.slane %v987_v42, 4  ;;  %v1002_v50 = vrot.slane %v1001_v45, 4 }
 0x1d6   : > { %v957_v51 = vrot.slane %v956_v37, 1  ;;  %v964_v52 = vrot.slane %v963_v41, 1  ;;  %v971_v53 = vrot.slane %v970_v40, 1  ;;  %v978_v54 = vrot.slane %v977_v46, 1 }
 0x1d7   : > { %v984_v43 = vadd.f32 %v983_v47, %v982_v38  ;;  %v998_v55 = vadd.f32 %v997_v48, %v996_v39  ;;  %v989_v56 = vadd.f32 %v988_v49, %v987_v42  ;;  %v1003_v57 = vadd.f32 %v1002_v50, %v1001_v45 }
 0x1d8   : > { %v958_v58 = vadd.f32 %v957_v51, %v956_v37  ;;  %v965_v59 = vadd.f32 %v964_v52, %v963_v41  ;;  %v972_v60 = vadd.f32 %v971_v53, %v970_v40  ;;  %v979_v61 = vadd.f32 %v978_v54, %v977_v46 }
 0x1d9   : > { %v985_v63 = vrot.slane %v984_v43, 1  ;;  %v999_v0 = vrot.slane %v998_v55, 1  ;;  %v990_v1 = vrot.slane %v989_v56, 2  ;;  %v1004_v2 = vrot.slane %v1003_v57, 2 }
 0x1da   : > { %v1017_v3 = vadd.f32 %v1427_v62, %v958_v58  ;;  %v1018_v4 = vadd.f32 %v1427_v62, %v965_v59  ;;  %v1019_v5 = vadd.f32 %v1427_v62, %v972_v60  ;;  %v1020_v6 = vadd.f32 %v1427_v62, %v979_v61 }
 0x1db   : > { %v986_v7 = vadd.f32 %v985_v63, %v984_v43  ;;  %v1000_v8 = vadd.f32 %v999_v0, %v998_v55  ;;  %v991_v9 = vadd.f32 %v990_v1, %v989_v56  ;;  %v1005_v10 = vadd.f32 %v1004_v2, %v1003_v57 }
 0x1dc   : > { %v1026_v11 = vmul.f32 0.125, %v1017_v3  ;;  %v1027_v12 = vmul.f32 0.125, %v1018_v4  ;;  %v1028_v13 = vmul.f32 0.125, %v1019_v5  ;;  %v1029_v14 = vmul.f32 0.125, %v1020_v6 }
 0x1dd   : > { %v992_v15 = vrot.slane %v991_v9, 1  ;;  %v1006_v16 = vrot.slane %v1005_v10, 1  ;;  %v1021_v17 = vadd.f32 %v1427_v62, %v986_v7  ;;  %v1023_v18 = vadd.f32 %v1427_v62, %v1000_v8 }
 0x1de   : > { %v1034_v19 = vmax.f32 %v1026_v11, 0.0  ;;  %v1035_v20 = vmax.f32 %v1027_v12, 0.0  ;;  %v1036_v21 = vmax.f32 %v1028_v13, 0.0  ;;  %v1037_v22 = vmax.f32 %v1029_v14, 0.0 }
 0x1df   : > { %v993_v23 = vadd.f32 %v992_v15, %v991_v9  ;;  %v1007_v24 = vadd.f32 %v1006_v16, %v1005_v10  ;;  %v1030_v25 = vmul.f32 0.125, %v1021_v17  ;;  %v1032_v26 = vmul.f32 0.125, %v1023_v18 }
 0x1e0   : > { %v1042_v27 = vadd.f32 1.01, %v1034_v19  ;;  %v1043_v28 = vadd.f32 1.01, %v1035_v20  ;;  %v1044_v32 = vadd.f32 1.01, %v1036_v21 }
 0x1e1   : > { %v1022_v29 = vadd.f32 %v1427_v62, %v993_v23  ;;  %v1024_v30 = vadd.f32 %v1427_v62, %v1007_v24  ;;  %v1038_v31 = vmax.f32 %v1030_v25, 0.0  ;;  %v1040_v33 = vmax.f32 %v1032_v26, 0.0 }
 0x1e2   : > { %v1045_v34 = vadd.f32 1.01, %v1037_v22  ;;  %1291 = vlog2.f32 %v1042_v27  ;;  %v1319_v19 = vmov 1966171168  }
 0x1e3   : > { %v1031_v35 = vmul.f32 0.125, %v1022_v29  ;;  %v1033_v36 = vmul.f32 0.125, %v1024_v30  ;;  %v1046_v37 = vadd.f32 1.01, %v1038_v31  ;;  %1293 = vlog2.f32 %v1043_v28 }
 0x1e4   : > { %1295 = vlog2.f32 %v1044_v32  ;;  %v1048_v40 = vadd.f32 1.01, %v1040_v33  ;;  %v1138_v20 = vunpack.c.l.s4 %v1319_v19 }
 0x1e5   : > { %v1039_v38 = vmax.f32 %v1031_v35, 0.0  ;;  %v1041_v39 = vmax.f32 %v1033_v36, 0.0  ;;  %1297 = vlog2.f32 %v1045_v34 }
 0x1e6   : > { %1299 = vlog2.f32 %v1046_v37  ;;  %v1139_v22 = vunpack.c.0.s8 %v1138_v20 }
 0x1e7   : > { %v1047_v41 = vadd.f32 1.01, %v1039_v38  ;;  %v1049_v42 = vadd.f32 1.01, %v1041_v39 }
 0x1e9   : > { %1301 = vlog2.f32 %v1047_v41 }
 0x1ea   : > { %1303 = vlog2.f32 %v1048_v40 }
 0x1eb   : > { %1305 = vlog2.f32 %v1049_v42  ;;  %v1142_v42 = vsub.s32 %v1139_v22, %v1424_v44 }
 0x1ec   : > { %v1292_v62 = vpop.eup %1291 }
 0x1ed   : > { %v1051_v45 = vmul.f32 0.6931472, %v1292_v62  ;;  %v1294_v46 = vpop.eup %1293 }
 0x1ee   : > { %v1296_v47 = vpop.eup %1295  ;;  %v1053_v48 = vmul.f32 0.6931472, %v1294_v46 }
 0x1ef   : > { %v1067_v49 = vsel %vm1066_vm2, %v1051_v45, 0.0  ;;  %v1298_v50 = vpop.eup %1297  ;;  %v1055_v51 = vmul.f32 0.6931472, %v1296_v47 }
 0x1f0   : > { %v1300_v52 = vpop.eup %1299  ;;  %v1057_v53 = vmul.f32 0.6931472, %v1298_v50  ;;  %v1068_v54 = vsel %vm1066_vm2, %v1053_v48, 0.0 }
 0x1f1   : > { %v1069_v43 = vadd.f32 %v1068_v54, %v1067_v49  ;;  %v1059_v56 = vmul.f32 0.6931472, %v1300_v52  ;;  %v1070_v57 = vsel %vm1066_vm2, %v1055_v51, 0.0 }
 0x1f2   : > { %v1072_v61 = vsel %vm1066_vm2, %v1057_v53, 0.0 }
 0x1f3   : > { %v1302_v55 = vpop.eup %1301  ;;  %v1071_v59 = vadd.f32 %v1070_v57, %v1069_v43  ;;  %v1074_v2 = vsel %vm1066_vm2, %v1059_v56, 0.0 }
 0x1f4   : > { %v1304_v58 = vpop.eup %1303  ;;  %v1061_v60 = vmul.f32 0.6931472, %v1302_v55 }
 0x1f5   : > { %v1306_v63 = vpop.eup %1305  ;;  %v1073_v0 = vadd.f32 %v1072_v61, %v1071_v59  ;;  %v1063_v1 = vmul.f32 0.6931472, %v1304_v58 }
 0x1f6   : > { %v1065_v4 = vmul.f32 0.6931472, %v1306_v63  ;;  %v1076_v5 = vsel %vm1066_vm2, %v1061_v60, 0.0 }
 0x1f7   : > { %v1075_v3 = vadd.f32 %v1074_v2, %v1073_v0  ;;  %v1078_v7 = vsel %vm1066_vm2, %v1063_v1, 0.0 }
 0x1f8   : > { %v1080_v9 = vsel %vm1066_vm2, %v1065_v4, 0.0 }
 0x1f9   : > { %v1077_v6 = vadd.f32 %v1076_v5, %v1075_v3 }
 0x1fb   : > { %v1079_v8 = vadd.f32 %v1078_v7, %v1077_v6 }
 0x1fd   : > { %v1081_v10 = vadd.f32 %v1080_v9, %v1079_v8 }
 0x1ff   : > { %1082 = vadd.xlane.f32.xlu0 %v1081_v10 }
 0x28c   : > { %v1083_v11 = vpop.xlane.xlu0 %1082 }
 0x28d   : > { %v1084_v12 = vrot.slane %v1083_v11, 4 }
 0x28f   : > { %v1085_v13 = vadd.f32 %v1084_v12, %v1083_v11 }
 0x291   : > { %v1086_v14 = vrot.slane %v1085_v13, 2 }
 0x293   : > { %v1087_v15 = vadd.f32 %v1086_v14, %v1085_v13 }
 0x295   : > { %v1088_v16 = vrot.slane %v1087_v15, 1 }
 0x297   : > { %v1089_v17 = vadd.f32 %v1088_v16, %v1087_v15 }
 0x299   : > { %1272 = vpush %v1089_v17 }
 0x2ca   : > { %s1273_s18 = spop %1272 }
 0x2cb   : > { %v1091_v18 = vstv %s1273_s18 }
 0x2cc   : > { %1307 = vrcp.f32 %v1091_v18 }
 0x2d6   : > { %v1308_v21 = vpop.eup %1307 }
 0x2d7   : > { %v1093_v23 = vmul.f32 %v1308_v21, %v1051_v45  ;;  %v1094_v24 = vmul.f32 %v1308_v21, %v1053_v48  ;;  %v1095_v25 = vmul.f32 %v1308_v21, %v1055_v51  ;;  %v1096_v26 = vmul.f32 %v1308_v21, %v1057_v53 }
 0x2d8   : > { %v1097_v27 = vmul.f32 %v1308_v21, %v1059_v56  ;;  %v1098_v28 = vmul.f32 %v1308_v21, %v1061_v60  ;;  %v1099_v29 = vmul.f32 %v1308_v21, %v1063_v1  ;;  %v1100_v30 = vmul.f32 %v1308_v21, %v1065_v4 }
 0x2d9   : > { %v1101_v31 = vmul.f32 1024.0, %v1093_v23  ;;  %v1102_v32 = vmul.f32 1024.0, %v1094_v24  ;;  %v1103_v33 = vmul.f32 1024.0, %v1095_v25  ;;  %v1104_v34 = vmul.f32 1024.0, %v1096_v26 }
 0x2da   : > { %v1105_v35 = vmul.f32 1024.0, %v1097_v27  ;;  %v1106_v36 = vmul.f32 1024.0, %v1098_v28  ;;  %v1107_v37 = vmul.f32 1024.0, %v1099_v29  ;;  %v1108_v38 = vmul.f32 1024.0, %v1100_v30 }
 0x2db   : > { %v1109_v39 = vmax.f32 %v1101_v31, 0.01  ;;  %v1110_v40 = vmax.f32 %v1102_v32, 0.01  ;;  %v1111_v41 = vmax.f32 %v1103_v33, 0.01 }
 0x2dc   : > { %v1112_v62 = vmax.f32 %v1104_v34, 0.01  ;;  %v1113_v45 = vmax.f32 %v1105_v35, 0.01  ;;  %v1114_v46 = vmax.f32 %v1106_v36, 0.01 }
 0x2dd   : > { %v1115_v47 = vmax.f32 %v1107_v37, 0.01  ;;  %v1116_v48 = vmax.f32 %v1108_v38, 0.01  ;;  %v1117_v49 = vmin.f32 %v1109_v39, 100.0  ;;  %v1118_v50 = vmin.f32 %v1110_v40, 100.0 }
 0x2de   : > { %v1119_v51 = vmin.f32 %v1111_v41, 100.0  ;;  %v1120_v52 = vmin.f32 %v1112_v62, 100.0  ;;  %v1121_v53 = vmin.f32 %v1113_v45, 100.0  ;;  %v1122_v54 = vmin.f32 %v1114_v46, 100.0 }
 0x2df   : > { %v1123_v43 = vmin.f32 %v1115_v47, 100.0  ;;  %v1124_v55 = vmin.f32 %v1116_v48, 100.0  ;;  %v1133_v56 = vcombine.low %v1117_v49, %v1118_v50 }
 0x2e0   : > { %v1134_v57 = vcombine.low %v1119_v51, %v1120_v52  ;;  %v1135_v58 = vcombine.low %v1121_v53, %v1122_v54 }
 0x2e1   : > { %v1136_v59 = vcombine.low %v1123_v43, %v1124_v55  ;;  %v1143_v60 = vrot.slane %v1133_v56, %v1142_v42 }
 0x2e2   : > { %v1150_v44 = vrot.slane %v1134_v57, %v1142_v42  ;;  %v1157_v61 = vrot.slane %v1135_v58, %v1142_v42 }
 0x2e3   : > { %v1164_v63 = vrot.slane %v1136_v59, %v1142_v42 }
 0x2e4   : > { %v1165_v0 = vcombine.low %v1143_v60, %v1150_v44 }
 0x2e5   : > { %v1166_v1 = vcombine.low %v1157_v61, %v1164_v63 }
 0x2e6   : > { %v1173_v2 = vrot.slane %v1165_v0, %v1142_v42 }
 0x2e7   : > { %v1180_v3 = vrot.slane %v1166_v1, %v1142_v42 }
 0x2e9   : > { %v1181_v4 = vcombine.low %v1173_v2, %v1180_v3 }
 0x2eb   : > { %1183 = vst [vmem:[%s278_s22] sm:$0xff] %v1181_v4 }
 0x2ec PF: > { %s19_s26 = sadd.s32 1, %s1315_s26  }
 0x2ed   : > { %p16_p4 = scmp.ge.s32.totalorder %s19_s26, 4  }
 0x2ef   :  { %18 = sbr.rel (!%p16_p4) target bundleno = 3 (0x3), region = 78 }

</bundles_post_ra>
